<compile_context>
chip_gen: v7x
topology: tpu7x:2x2x1
jax: 0.10.0
libtpu: 0.0.40
codegen_flags: <defaults>
</compile_context>

<pallas_src>
import functools
import math

import jax
import jax.numpy as jnp
from jax.experimental import pallas as pl
from jax.experimental.pallas import tpu as pltpu


_VMEM_LIMIT = 48 * 1024 * 1024  # above 32 MiB scoped default, below v7x 64 MiB


def _round_up(n, m):
    return ((n + m - 1) // m) * m


# --------------------------------------------------------------------------
# tanh-approximate GELU: ~6 VALU ops + 1 EUP tanh per element (vs ~12 VALU +
# exp + reciprocal for the erf chain).  |err| vs exact erf-GELU ~3e-4.
# --------------------------------------------------------------------------
_SQRT_2_OVER_PI = 0.7978845608028654


def _gelu_tanh(x):
    return 0.5 * x * (1.0 + jnp.tanh(_SQRT_2_OVER_PI * (x + 0.044715 * x * x * x)))


# --------------------------------------------------------------------------
# Kernel 1: complex spectral mode mixing (both mode corners fused on lanes)
#   out[b, o, m] = sum_i x[b, i, m] * w[i, o, m]   (complex multiply)
# Layout: modes (padded to a multiple of 128) on lanes, Cout on sublanes,
# Cin accumulated in-kernel.  Weights keep the PyTorch-native Cin-leading
# layout (Cin, Cout, Mp), so w_ref[i] is a contiguous (t_cout, Mp) tile.
# --------------------------------------------------------------------------
def _spectral_mix_kernel(xr_ref, xi_ref, wr_ref, wi_ref, or_ref, oi_ref):
    cin = wr_ref.shape[0]
    tco = or_ref.shape[1]
    mp = or_ref.shape[2]
    acc_r = jnp.zeros((tco, mp), jnp.float32)
    acc_i = jnp.zeros((tco, mp), jnp.float32)
    # Statically unrolled accumulation over Cin: all indices are compile-time
    # constants, the live set is two accumulators + 4 operand tiles (no
    # (Cout, Cin, Mp) temporaries -> no spills, pure VALU streaming).
    for i in range(cin):
        a = xr_ref[:, i, :]          # (1, Mp)      Re(x[b, i, :])
        b = xi_ref[:, i, :]          # (1, Mp)      Im(x[b, i, :])
        c = wr_ref[i]                # (t_cout, Mp) Re(w[i, co_blk, :])
        d = wi_ref[i]                # (t_cout, Mp) Im(w[i, co_blk, :])
        acc_r = acc_r + (a * c - b * d)   # plain 4-mul / 2-add complex product
        acc_i = acc_i + (a * d + b * c)
    or_ref[0] = acc_r
    oi_ref[0] = acc_i


def _pick_cout_tile(cout):
    # Keep weight residency + temporaries bounded (matters on v7x 64 MiB VMEM
    # at realistic widths); full Cout at toy sizes.
    if cout <= 32:
        return cout
    for cand in (32, 16, 8):
        if cout % cand == 0:
            return cand
    return cout


def spectral_mix(xr, xi, wr, wi):
    # xr/xi: (B, Cin, Mp) f32;  wr/wi: (Cin, Cout, Mp) f32;  Mp % 128 == 0
    B, Cin, Mp = xr.shape
    Cout = wr.shape[1]
    tco = _pick_cout_tile(Cout)
    return pl.pallas_call(
        _spectral_mix_kernel,
        out_shape=(jax.ShapeDtypeStruct((B, Cout, Mp), jnp.float32),
                   jax.ShapeDtypeStruct((B, Cout, Mp), jnp.float32)),
        grid=(B, Cout // tco),
        in_specs=[
            pl.BlockSpec((1, Cin, Mp), lambda b, co: (b, 0, 0)),
            pl.BlockSpec((1, Cin, Mp), lambda b, co: (b, 0, 0)),
            pl.BlockSpec((Cin, tco, Mp), lambda b, co: (0, co, 0)),
            pl.BlockSpec((Cin, tco, Mp), lambda b, co: (0, co, 0)),
        ],
        out_specs=(pl.BlockSpec((1, tco, Mp), lambda b, co: (b, co, 0)),
                   pl.BlockSpec((1, tco, Mp), lambda b, co: (b, co, 0))),
        compiler_params=pltpu.CompilerParams(
            dimension_semantics=("parallel", "parallel"),
            vmem_limit_bytes=_VMEM_LIMIT),
    )(xr, xi, wr, wi)


# --------------------------------------------------------------------------
# Kernel 2: fused 1x1 conv (channel matmul) + bias + residual add (+ GELU),
# lane-dense: H*W on lanes, channels on sublanes, NCHW-native.
# --------------------------------------------------------------------------
def _pointwise_kernel(x_ref, w_ref, b_ref, s_ref, o_ref, *, apply_gelu, use_bf16):
    x = x_ref[0]                     # (Cin, thw)   hw on lanes
    w = w_ref[...]                   # (Cout, Cin)
    if use_bf16:
        # bf16 operands: ~3x fewer MXU passes on v6e/v7x; accumulate in f32 and
        # keep the entire epilogue in f32 (v5e has no bf16 VALU/EUP path).
        x = x.astype(jnp.bfloat16)
        w = w.astype(jnp.bfloat16)
    y = jnp.dot(w, x, preferred_element_type=jnp.float32)   # (Cout, thw) f32
    y = y + b_ref[...] + s_ref[0]
    if apply_gelu:
        y = _gelu_tanh(y)
    o_ref[0] = y.astype(o_ref.dtype)


def _pick_hw_tile(hw_padded, cap=8192):
    # Largest multiple-of-128 divisor of the (already 128-padded) HW, capped at
    # 8192: HBM-bound kernel, bigger tiles amortize the ~0.35us/step overhead
    # and stay tiny vs even v7x's 64 MiB VMEM at FNO widths.
    k = min(hw_padded, cap) // 128
    while k > 1:
        if hw_padded % (128 * k) == 0:
            return 128 * k
        k -= 1
    return 128


def pointwise_add_act(x3d, w_t, bias_col, spec3d, apply_gelu, use_bf16):
    # x3d: (B, Cin, HW), spec3d: (B, Cout, HW), w_t: (Cout, Cin), bias: (Cout,1)
    B, Cin, HW = x3d.shape
    Cout = w_t.shape[0]
    HWp = _round_up(HW, 128)
    if HWp != HW:
        pad = ((0, 0), (0, 0), (0, HWp - HW))
        x3d = jnp.pad(x3d, pad)
        spec3d = jnp.pad(spec3d, pad)
    thw = _pick_hw_tile(HWp)
    kernel = functools.partial(_pointwise_kernel, apply_gelu=apply_gelu,
                               use_bf16=use_bf16)
    out = pl.pallas_call(
        kernel,
        out_shape=jax.ShapeDtypeStruct((B, Cout, HWp), jnp.float32),
        grid=(B, HWp // thw),
        in_specs=[
            pl.BlockSpec((1, Cin, thw), lambda b, j: (b, 0, j)),
            pl.BlockSpec((Cout, Cin), lambda b, j: (0, 0)),
            pl.BlockSpec((Cout, 1), lambda b, j: (0, 0)),
            pl.BlockSpec((1, Cout, thw), lambda b, j: (b, 0, j)),
        ],
        out_specs=pl.BlockSpec((1, Cout, thw), lambda b, j: (b, 0, j)),
        input_output_aliases={3: 0},   # reuse the residual buffer as output
        compiler_params=pltpu.CompilerParams(
            dimension_semantics=("parallel", "parallel"),
            vmem_limit_bytes=_VMEM_LIMIT),
    )(x3d, w_t, bias_col, spec3d)
    return out if HWp == HW else out[:, :, :HW]


# --------------------------------------------------------------------------
# Spectral weight packing: done ONCE at parameter-load time, not per forward.
# --------------------------------------------------------------------------
def pack_spectral_weights(w1r, w1i, w2r, w2i):
    """(Cin, Cout, m1, m2) corner weights -> lane-dense (Cin, Cout, Mp) re/im."""
    Cin, Cout, m1, m2 = w1r.shape
    M2 = 2 * m1 * m2
    Mp = _round_up(M2, 128)

    def pack(top, bot):
        w = jnp.concatenate([top, bot], axis=2).reshape(Cin, Cout, M2)
        return jnp.pad(w, ((0, 0), (0, 0), (0, Mp - M2))).astype(jnp.float32)

    return pack(w1r, w2r), pack(w1i, w2i)


# --------------------------------------------------------------------------
# SpectralConv2d_fast forward (FFT glue in XLA, mode mixing in Pallas)
# --------------------------------------------------------------------------
def spectral_conv2d(x, wr_packed, wi_packed, modes1, modes2):
    # TODO(synk): rfft2/irfft2 have no Pallas TPU primitive; FFT stays in XLA.
    B, C, H, W = x.shape
    Cout = wr_packed.shape[1]
    Mp = wr_packed.shape[2]
    m1, m2 = modes1, modes2
    Wf = W // 2 + 1
    M2 = 2 * m1 * m2
    assert H >= 2 * m1 and Wf >= m2, "mode count exceeds spatial resolution"

    x_ft = jnp.fft.rfft2(x)                                   # (B, C, H, Wf)
    # Fuse the top and bottom mode corners along the mode (lane) axis.
    modes = jnp.concatenate(
        [x_ft[:, :, :m1, :m2], x_ft[:, :, H - m1:, :m2]], axis=2)  # (B,C,2m1,m2)
    xr = jnp.real(modes).reshape(B, C, M2).astype(jnp.float32)
    xi = jnp.imag(modes).reshape(B, C, M2).astype(jnp.float32)
    if Mp != M2:
        pad = ((0, 0), (0, 0), (0, Mp - M2))
        xr = jnp.pad(xr, pad)
        xi = jnp.pad(xi, pad)

    out_r, out_i = spectral_mix(xr, xi, wr_packed, wi_packed)
    out_c = (out_r[:, :, :M2] + 1j * out_i[:, :, :M2]).reshape(
        B, Cout, 2 * m1, m2).astype(jnp.complex64)

    # Assemble out_ft by concat + zero-pad (no full-size scatter into zeros).
    mid = jnp.zeros((B, Cout, H - 2 * m1, m2), jnp.complex64)
    left = jnp.concatenate([out_c[:, :, :m1], mid, out_c[:, :, m1:]], axis=2)
    out_ft = jnp.concatenate(
        [left, jnp.zeros((B, Cout, H, Wf - m2), jnp.complex64)], axis=3)

    return jnp.fft.irfft2(out_ft, s=(H, W)).astype(jnp.float32)


# --------------------------------------------------------------------------
# FNO2d forward (stays NCHW throughout; reshapes are metadata-only)
# --------------------------------------------------------------------------
def fno2d_forward(x, params, *, modes1, modes2):
    B, C, H, W = x.shape
    HW = H * W
    use_bf16 = C >= 32          # skip the bf16 MXU cast at toy widths
    for layer in range(4):
        wr, wi = params["spectral_packed"][layer]
        spec = spectral_conv2d(x, wr, wi, modes1, modes2)
        w, b = params["pointwise"][layer]                  # (Cout,Cin,1,1), (Cout,)
        y3d = pointwise_add_act(x.reshape(B, C, HW), w[:, :, 0, 0],
                                b.reshape(-1, 1), spec.reshape(B, C, HW),
                                apply_gelu=(layer < 3), use_bf16=use_bf16)
        x = y3d.reshape(B, C, H, W)
    return x


# Pure-JAX reference (mirrors the PyTorch forward, exact erf GELU).
def fno2d_reference(x, params, modes1, modes2):
    B, C, H, W = x.shape
    for layer in range(4):
        w1r, w1i, w2r, w2i = params["spectral"][layer]
        w1 = w1r + 1j * w1i
        w2 = w2r + 1j * w2i
        x_ft = jnp.fft.rfft2(x)
        out_ft = jnp.zeros((B, C, H, W // 2 + 1), dtype=jnp.complex64)
        out_ft = out_ft.at[:, :, :modes1, :modes2].set(
            jnp.einsum('bixy,ioxy->boxy', x_ft[:, :, :modes1, :modes2], w1))
        out_ft = out_ft.at[:, :, H - modes1:, :modes2].set(
            jnp.einsum('bixy,ioxy->boxy', x_ft[:, :, H - modes1:, :modes2], w2))
        x1 = jnp.fft.irfft2(out_ft, s=(H, W)).astype(jnp.float32)
        w, b = params["pointwise"][layer]
        x2 = jnp.einsum('oi,bihw->bohw', w[:, :, 0, 0], x) \
            + b[None, :, None, None]
        x = x1 + x2
        if layer < 3:
            x = jax.nn.gelu(x, approximate=False)
    return x


if __name__ == "__main__":
    modes1, modes2, width = 4, 4, 8
    B, H, W = 2, 16, 16

    key = jax.random.PRNGKey(0)
    scale = 1.0 / (width * width)
    spectral_params, pointwise_params = [], []
    for _ in range(4):
        key, k1, k2, k3, k4, kw, kb = jax.random.split(key, 7)
        # torch.rand(cfloat): real & imag each uniform[0,1), scaled.
        spectral_params.append(tuple(
            scale * jax.random.uniform(k, (width, width, modes1, modes2),
                                       dtype=jnp.float32)
            for k in (k1, k2, k3, k4)))
        bound = 1.0 / math.sqrt(width)
        pointwise_params.append((
            jax.random.uniform(kw, (width, width, 1, 1), dtype=jnp.float32,
                               minval=-bound, maxval=bound),
            jax.random.uniform(kb, (width,), dtype=jnp.float32,
                               minval=-bound, maxval=bound)))
    params = {"spectral": spectral_params, "pointwise": pointwise_params}

    # Pre-pack spectral weights once (outside the jitted forward).
    run_params = {
        "spectral_packed": [pack_spectral_weights(*sp) for sp in spectral_params],
        "pointwise": pointwise_params,
    }

    key, kx = jax.random.split(key)
    x = jax.random.normal(kx, (B, width, H, W), dtype=jnp.float32)

    fwd = jax.jit(functools.partial(fno2d_forward, modes1=modes1, modes2=modes2))
    out = jax.block_until_ready(fwd(x, run_params))

    ref = fno2d_reference(x, params, modes1, modes2)
    err = float(jnp.max(jnp.abs(out - ref)))
    assert out.shape == (B, width, H, W), out.shape
    assert err < 1e-2, f"mismatch vs reference: {err}"
    print("KERNEL_OK")
</pallas_src>

<mosaic_0001>
module attributes {stable_mosaic.version = 11 : i64} {
  func.func @_spectral_mix_kernel(%arg0: i32, %arg1: i32, %arg2: memref<1x8x128xf32, #tpu.memory_space<vmem>>, %arg3: memref<1x8x128xf32, #tpu.memory_space<vmem>>, %arg4: memref<8x8x128xf32, #tpu.memory_space<vmem>>, %arg5: memref<8x8x128xf32, #tpu.memory_space<vmem>>, %arg6: memref<1x8x128xf32, #tpu.memory_space<vmem>>, %arg7: memref<1x8x128xf32, #tpu.memory_space<vmem>>) attributes {dimension_semantics = [#tpu.dimension_semantics<parallel>, #tpu.dimension_semantics<parallel>], iteration_bounds = array<i64: 2, 1>, scalar_prefetch = 0 : i64, scratch_operands = 0 : i64, tpu.core_type = #tpu.core_type<tc>, window_params = [{transform_indices = @transform_0, window_bounds = array<i64: 1, 8, 128>}, {transform_indices = @transform_1, window_bounds = array<i64: 1, 8, 128>}, {transform_indices = @transform_2, window_bounds = array<i64: 8, 8, 128>}, {transform_indices = @transform_3, window_bounds = array<i64: 8, 8, 128>}, {transform_indices = @transform_4, window_bounds = array<i64: 1, 8, 128>}, {transform_indices = @transform_5, window_bounds = array<i64: 1, 8, 128>}]} {
    %cst = arith.constant 0.000000e+00 : f32
    %0 = vector.broadcast %cst : f32 to vector<8x128xf32>
    %cst_0 = arith.constant 0.000000e+00 : f32
    %1 = vector.broadcast %cst_0 : f32 to vector<8x128xf32>
    %c0 = arith.constant 0 : index
    %c0_1 = arith.constant 0 : index
    %c0_2 = arith.constant 0 : index
    %2 = vector.load %arg2[%c0, %c0_1, %c0_2] : memref<1x8x128xf32, #tpu.memory_space<vmem>>, vector<1x1x128xf32>
    %3 = vector.shape_cast %2 : vector<1x1x128xf32> to vector<1x128xf32>
    %c0_3 = arith.constant 0 : index
    %c0_4 = arith.constant 0 : index
    %c0_5 = arith.constant 0 : index
    %4 = vector.load %arg3[%c0_3, %c0_4, %c0_5] : memref<1x8x128xf32, #tpu.memory_space<vmem>>, vector<1x1x128xf32>
    %5 = vector.shape_cast %4 : vector<1x1x128xf32> to vector<1x128xf32>
    %c0_6 = arith.constant 0 : index
    %c0_7 = arith.constant 0 : index
    %c0_8 = arith.constant 0 : index
    %6 = vector.load %arg4[%c0_6, %c0_7, %c0_8] : memref<8x8x128xf32, #tpu.memory_space<vmem>>, vector<1x8x128xf32>
    %7 = vector.shape_cast %6 : vector<1x8x128xf32> to vector<8x128xf32>
    %c0_9 = arith.constant 0 : index
    %c0_10 = arith.constant 0 : index
    %c0_11 = arith.constant 0 : index
    %8 = vector.load %arg5[%c0_9, %c0_10, %c0_11] : memref<8x8x128xf32, #tpu.memory_space<vmem>>, vector<1x8x128xf32>
    %9 = vector.shape_cast %8 : vector<1x8x128xf32> to vector<8x128xf32>
    %10 = vector.broadcast %3 : vector<1x128xf32> to vector<8x128xf32>
    %11 = arith.mulf %10, %7 : vector<8x128xf32>
    %12 = vector.broadcast %5 : vector<1x128xf32> to vector<8x128xf32>
    %13 = arith.mulf %12, %9 : vector<8x128xf32>
    %14 = arith.subf %11, %13 : vector<8x128xf32>
    %15 = arith.addf %0, %14 : vector<8x128xf32>
    %16 = vector.broadcast %3 : vector<1x128xf32> to vector<8x128xf32>
    %17 = arith.mulf %16, %9 : vector<8x128xf32>
    %18 = vector.broadcast %5 : vector<1x128xf32> to vector<8x128xf32>
    %19 = arith.mulf %18, %7 : vector<8x128xf32>
    %20 = arith.addf %17, %19 : vector<8x128xf32>
    %21 = arith.addf %1, %20 : vector<8x128xf32>
    %c0_12 = arith.constant 0 : index
    %c1 = arith.constant 1 : index
    %c0_13 = arith.constant 0 : index
    %22 = vector.load %arg2[%c0_12, %c1, %c0_13] : memref<1x8x128xf32, #tpu.memory_space<vmem>>, vector<1x1x128xf32>
    %23 = vector.shape_cast %22 : vector<1x1x128xf32> to vector<1x128xf32>
    %c0_14 = arith.constant 0 : index
    %c1_15 = arith.constant 1 : index
    %c0_16 = arith.constant 0 : index
    %24 = vector.load %arg3[%c0_14, %c1_15, %c0_16] : memref<1x8x128xf32, #tpu.memory_space<vmem>>, vector<1x1x128xf32>
    %25 = vector.shape_cast %24 : vector<1x1x128xf32> to vector<1x128xf32>
    %c1_17 = arith.constant 1 : index
    %c0_18 = arith.constant 0 : index
    %c0_19 = arith.constant 0 : index
    %26 = vector.load %arg4[%c1_17, %c0_18, %c0_19] : memref<8x8x128xf32, #tpu.memory_space<vmem>>, vector<1x8x128xf32>
    %27 = vector.shape_cast %26 : vector<1x8x128xf32> to vector<8x128xf32>
    %c1_20 = arith.constant 1 : index
    %c0_21 = arith.constant 0 : index
    %c0_22 = arith.constant 0 : index
    %28 = vector.load %arg5[%c1_20, %c0_21, %c0_22] : memref<8x8x128xf32, #tpu.memory_space<vmem>>, vector<1x8x128xf32>
    %29 = vector.shape_cast %28 : vector<1x8x128xf32> to vector<8x128xf32>
    %30 = vector.broadcast %23 : vector<1x128xf32> to vector<8x128xf32>
    %31 = arith.mulf %30, %27 : vector<8x128xf32>
    %32 = vector.broadcast %25 : vector<1x128xf32> to vector<8x128xf32>
    %33 = arith.mulf %32, %29 : vector<8x128xf32>
    %34 = arith.subf %31, %33 : vector<8x128xf32>
    %35 = arith.addf %15, %34 : vector<8x128xf32>
    %36 = vector.broadcast %23 : vector<1x128xf32> to vector<8x128xf32>
    %37 = arith.mulf %36, %29 : vector<8x128xf32>
    %38 = vector.broadcast %25 : vector<1x128xf32> to vector<8x128xf32>
    %39 = arith.mulf %38, %27 : vector<8x128xf32>
    %40 = arith.addf %37, %39 : vector<8x128xf32>
    %41 = arith.addf %21, %40 : vector<8x128xf32>
    %c0_23 = arith.constant 0 : index
    %c2 = arith.constant 2 : index
    %c0_24 = arith.constant 0 : index
    %42 = vector.load %arg2[%c0_23, %c2, %c0_24] : memref<1x8x128xf32, #tpu.memory_space<vmem>>, vector<1x1x128xf32>
    %43 = vector.shape_cast %42 : vector<1x1x128xf32> to vector<1x128xf32>
    %c0_25 = arith.constant 0 : index
    %c2_26 = arith.constant 2 : index
    %c0_27 = arith.constant 0 : index
    %44 = vector.load %arg3[%c0_25, %c2_26, %c0_27] : memref<1x8x128xf32, #tpu.memory_space<vmem>>, vector<1x1x128xf32>
    %45 = vector.shape_cast %44 : vector<1x1x128xf32> to vector<1x128xf32>
    %c2_28 = arith.constant 2 : index
    %c0_29 = arith.constant 0 : index
    %c0_30 = arith.constant 0 : index
    %46 = vector.load %arg4[%c2_28, %c0_29, %c0_30] : memref<8x8x128xf32, #tpu.memory_space<vmem>>, vector<1x8x128xf32>
    %47 = vector.shape_cast %46 : vector<1x8x128xf32> to vector<8x128xf32>
    %c2_31 = arith.constant 2 : index
    %c0_32 = arith.constant 0 : index
    %c0_33 = arith.constant 0 : index
    %48 = vector.load %arg5[%c2_31, %c0_32, %c0_33] : memref<8x8x128xf32, #tpu.memory_space<vmem>>, vector<1x8x128xf32>
    %49 = vector.shape_cast %48 : vector<1x8x128xf32> to vector<8x128xf32>
    %50 = vector.broadcast %43 : vector<1x128xf32> to vector<8x128xf32>
    %51 = arith.mulf %50, %47 : vector<8x128xf32>
    %52 = vector.broadcast %45 : vector<1x128xf32> to vector<8x128xf32>
    %53 = arith.mulf %52, %49 : vector<8x128xf32>
    %54 = arith.subf %51, %53 : vector<8x128xf32>
    %55 = arith.addf %35, %54 : vector<8x128xf32>
    %56 = vector.broadcast %43 : vector<1x128xf32> to vector<8x128xf32>
    %57 = arith.mulf %56, %49 : vector<8x128xf32>
    %58 = vector.broadcast %45 : vector<1x128xf32> to vector<8x128xf32>
    %59 = arith.mulf %58, %47 : vector<8x128xf32>
    %60 = arith.addf %57, %59 : vector<8x128xf32>
    %61 = arith.addf %41, %60 : vector<8x128xf32>
    %c0_34 = arith.constant 0 : index
    %c3 = arith.constant 3 : index
    %c0_35 = arith.constant 0 : index
    %62 = vector.load %arg2[%c0_34, %c3, %c0_35] : memref<1x8x128xf32, #tpu.memory_space<vmem>>, vector<1x1x128xf32>
    %63 = vector.shape_cast %62 : vector<1x1x128xf32> to vector<1x128xf32>
    %c0_36 = arith.constant 0 : index
    %c3_37 = arith.constant 3 : index
    %c0_38 = arith.constant 0 : index
    %64 = vector.load %arg3[%c0_36, %c3_37, %c0_38] : memref<1x8x128xf32, #tpu.memory_space<vmem>>, vector<1x1x128xf32>
    %65 = vector.shape_cast %64 : vector<1x1x128xf32> to vector<1x128xf32>
    %c3_39 = arith.constant 3 : index
    %c0_40 = arith.constant 0 : index
    %c0_41 = arith.constant 0 : index
    %66 = vector.load %arg4[%c3_39, %c0_40, %c0_41] : memref<8x8x128xf32, #tpu.memory_space<vmem>>, vector<1x8x128xf32>
    %67 = vector.shape_cast %66 : vector<1x8x128xf32> to vector<8x128xf32>
    %c3_42 = arith.constant 3 : index
    %c0_43 = arith.constant 0 : index
    %c0_44 = arith.constant 0 : index
    %68 = vector.load %arg5[%c3_42, %c0_43, %c0_44] : memref<8x8x128xf32, #tpu.memory_space<vmem>>, vector<1x8x128xf32>
    %69 = vector.shape_cast %68 : vector<1x8x128xf32> to vector<8x128xf32>
    %70 = vector.broadcast %63 : vector<1x128xf32> to vector<8x128xf32>
    %71 = arith.mulf %70, %67 : vector<8x128xf32>
    %72 = vector.broadcast %65 : vector<1x128xf32> to vector<8x128xf32>
    %73 = arith.mulf %72, %69 : vector<8x128xf32>
    %74 = arith.subf %71, %73 : vector<8x128xf32>
    %75 = arith.addf %55, %74 : vector<8x128xf32>
    %76 = vector.broadcast %63 : vector<1x128xf32> to vector<8x128xf32>
    %77 = arith.mulf %76, %69 : vector<8x128xf32>
    %78 = vector.broadcast %65 : vector<1x128xf32> to vector<8x128xf32>
    %79 = arith.mulf %78, %67 : vector<8x128xf32>
    %80 = arith.addf %77, %79 : vector<8x128xf32>
    %81 = arith.addf %61, %80 : vector<8x128xf32>
    %c0_45 = arith.constant 0 : index
    %c4 = arith.constant 4 : index
    %c0_46 = arith.constant 0 : index
    %82 = vector.load %arg2[%c0_45, %c4, %c0_46] : memref<1x8x128xf32, #tpu.memory_space<vmem>>, vector<1x1x128xf32>
    %83 = vector.shape_cast %82 : vector<1x1x128xf32> to vector<1x128xf32>
    %c0_47 = arith.constant 0 : index
    %c4_48 = arith.constant 4 : index
    %c0_49 = arith.constant 0 : index
    %84 = vector.load %arg3[%c0_47, %c4_48, %c0_49] : memref<1x8x128xf32, #tpu.memory_space<vmem>>, vector<1x1x128xf32>
    %85 = vector.shape_cast %84 : vector<1x1x128xf32> to vector<1x128xf32>
    %c4_50 = arith.constant 4 : index
    %c0_51 = arith.constant 0 : index
    %c0_52 = arith.constant 0 : index
    %86 = vector.load %arg4[%c4_50, %c0_51, %c0_52] : memref<8x8x128xf32, #tpu.memory_space<vmem>>, vector<1x8x128xf32>
    %87 = vector.shape_cast %86 : vector<1x8x128xf32> to vector<8x128xf32>
    %c4_53 = arith.constant 4 : index
    %c0_54 = arith.constant 0 : index
    %c0_55 = arith.constant 0 : index
    %88 = vector.load %arg5[%c4_53, %c0_54, %c0_55] : memref<8x8x128xf32, #tpu.memory_space<vmem>>, vector<1x8x128xf32>
    %89 = vector.shape_cast %88 : vector<1x8x128xf32> to vector<8x128xf32>
    %90 = vector.broadcast %83 : vector<1x128xf32> to vector<8x128xf32>
    %91 = arith.mulf %90, %87 : vector<8x128xf32>
    %92 = vector.broadcast %85 : vector<1x128xf32> to vector<8x128xf32>
    %93 = arith.mulf %92, %89 : vector<8x128xf32>
    %94 = arith.subf %91, %93 : vector<8x128xf32>
    %95 = arith.addf %75, %94 : vector<8x128xf32>
    %96 = vector.broadcast %83 : vector<1x128xf32> to vector<8x128xf32>
    %97 = arith.mulf %96, %89 : vector<8x128xf32>
    %98 = vector.broadcast %85 : vector<1x128xf32> to vector<8x128xf32>
    %99 = arith.mulf %98, %87 : vector<8x128xf32>
    %100 = arith.addf %97, %99 : vector<8x128xf32>
    %101 = arith.addf %81, %100 : vector<8x128xf32>
    %c0_56 = arith.constant 0 : index
    %c5 = arith.constant 5 : index
    %c0_57 = arith.constant 0 : index
    %102 = vector.load %arg2[%c0_56, %c5, %c0_57] : memref<1x8x128xf32, #tpu.memory_space<vmem>>, vector<1x1x128xf32>
    %103 = vector.shape_cast %102 : vector<1x1x128xf32> to vector<1x128xf32>
    %c0_58 = arith.constant 0 : index
    %c5_59 = arith.constant 5 : index
    %c0_60 = arith.constant 0 : index
    %104 = vector.load %arg3[%c0_58, %c5_59, %c0_60] : memref<1x8x128xf32, #tpu.memory_space<vmem>>, vector<1x1x128xf32>
    %105 = vector.shape_cast %104 : vector<1x1x128xf32> to vector<1x128xf32>
    %c5_61 = arith.constant 5 : index
    %c0_62 = arith.constant 0 : index
    %c0_63 = arith.constant 0 : index
    %106 = vector.load %arg4[%c5_61, %c0_62, %c0_63] : memref<8x8x128xf32, #tpu.memory_space<vmem>>, vector<1x8x128xf32>
    %107 = vector.shape_cast %106 : vector<1x8x128xf32> to vector<8x128xf32>
    %c5_64 = arith.constant 5 : index
    %c0_65 = arith.constant 0 : index
    %c0_66 = arith.constant 0 : index
    %108 = vector.load %arg5[%c5_64, %c0_65, %c0_66] : memref<8x8x128xf32, #tpu.memory_space<vmem>>, vector<1x8x128xf32>
    %109 = vector.shape_cast %108 : vector<1x8x128xf32> to vector<8x128xf32>
    %110 = vector.broadcast %103 : vector<1x128xf32> to vector<8x128xf32>
    %111 = arith.mulf %110, %107 : vector<8x128xf32>
    %112 = vector.broadcast %105 : vector<1x128xf32> to vector<8x128xf32>
    %113 = arith.mulf %112, %109 : vector<8x128xf32>
    %114 = arith.subf %111, %113 : vector<8x128xf32>
    %115 = arith.addf %95, %114 : vector<8x128xf32>
    %116 = vector.broadcast %103 : vector<1x128xf32> to vector<8x128xf32>
    %117 = arith.mulf %116, %109 : vector<8x128xf32>
    %118 = vector.broadcast %105 : vector<1x128xf32> to vector<8x128xf32>
    %119 = arith.mulf %118, %107 : vector<8x128xf32>
    %120 = arith.addf %117, %119 : vector<8x128xf32>
    %121 = arith.addf %101, %120 : vector<8x128xf32>
    %c0_67 = arith.constant 0 : index
    %c6 = arith.constant 6 : index
    %c0_68 = arith.constant 0 : index
    %122 = vector.load %arg2[%c0_67, %c6, %c0_68] : memref<1x8x128xf32, #tpu.memory_space<vmem>>, vector<1x1x128xf32>
    %123 = vector.shape_cast %122 : vector<1x1x128xf32> to vector<1x128xf32>
    %c0_69 = arith.constant 0 : index
    %c6_70 = arith.constant 6 : index
    %c0_71 = arith.constant 0 : index
    %124 = vector.load %arg3[%c0_69, %c6_70, %c0_71] : memref<1x8x128xf32, #tpu.memory_space<vmem>>, vector<1x1x128xf32>
    %125 = vector.shape_cast %124 : vector<1x1x128xf32> to vector<1x128xf32>
    %c6_72 = arith.constant 6 : index
    %c0_73 = arith.constant 0 : index
    %c0_74 = arith.constant 0 : index
    %126 = vector.load %arg4[%c6_72, %c0_73, %c0_74] : memref<8x8x128xf32, #tpu.memory_space<vmem>>, vector<1x8x128xf32>
    %127 = vector.shape_cast %126 : vector<1x8x128xf32> to vector<8x128xf32>
    %c6_75 = arith.constant 6 : index
    %c0_76 = arith.constant 0 : index
    %c0_77 = arith.constant 0 : index
    %128 = vector.load %arg5[%c6_75, %c0_76, %c0_77] : memref<8x8x128xf32, #tpu.memory_space<vmem>>, vector<1x8x128xf32>
    %129 = vector.shape_cast %128 : vector<1x8x128xf32> to vector<8x128xf32>
    %130 = vector.broadcast %123 : vector<1x128xf32> to vector<8x128xf32>
    %131 = arith.mulf %130, %127 : vector<8x128xf32>
    %132 = vector.broadcast %125 : vector<1x128xf32> to vector<8x128xf32>
    %133 = arith.mulf %132, %129 : vector<8x128xf32>
    %134 = arith.subf %131, %133 : vector<8x128xf32>
    %135 = arith.addf %115, %134 : vector<8x128xf32>
    %136 = vector.broadcast %123 : vector<1x128xf32> to vector<8x128xf32>
    %137 = arith.mulf %136, %129 : vector<8x128xf32>
    %138 = vector.broadcast %125 : vector<1x128xf32> to vector<8x128xf32>
    %139 = arith.mulf %138, %127 : vector<8x128xf32>
    %140 = arith.addf %137, %139 : vector<8x128xf32>
    %141 = arith.addf %121, %140 : vector<8x128xf32>
    %c0_78 = arith.constant 0 : index
    %c7 = arith.constant 7 : index
    %c0_79 = arith.constant 0 : index
    %142 = vector.load %arg2[%c0_78, %c7, %c0_79] : memref<1x8x128xf32, #tpu.memory_space<vmem>>, vector<1x1x128xf32>
    %143 = vector.shape_cast %142 : vector<1x1x128xf32> to vector<1x128xf32>
    %c0_80 = arith.constant 0 : index
    %c7_81 = arith.constant 7 : index
    %c0_82 = arith.constant 0 : index
    %144 = vector.load %arg3[%c0_80, %c7_81, %c0_82] : memref<1x8x128xf32, #tpu.memory_space<vmem>>, vector<1x1x128xf32>
    %145 = vector.shape_cast %144 : vector<1x1x128xf32> to vector<1x128xf32>
    %c7_83 = arith.constant 7 : index
    %c0_84 = arith.constant 0 : index
    %c0_85 = arith.constant 0 : index
    %146 = vector.load %arg4[%c7_83, %c0_84, %c0_85] : memref<8x8x128xf32, #tpu.memory_space<vmem>>, vector<1x8x128xf32>
    %147 = vector.shape_cast %146 : vector<1x8x128xf32> to vector<8x128xf32>
    %c7_86 = arith.constant 7 : index
    %c0_87 = arith.constant 0 : index
    %c0_88 = arith.constant 0 : index
    %148 = vector.load %arg5[%c7_86, %c0_87, %c0_88] : memref<8x8x128xf32, #tpu.memory_space<vmem>>, vector<1x8x128xf32>
    %149 = vector.shape_cast %148 : vector<1x8x128xf32> to vector<8x128xf32>
    %150 = vector.broadcast %143 : vector<1x128xf32> to vector<8x128xf32>
    %151 = arith.mulf %150, %147 : vector<8x128xf32>
    %152 = vector.broadcast %145 : vector<1x128xf32> to vector<8x128xf32>
    %153 = arith.mulf %152, %149 : vector<8x128xf32>
    %154 = arith.subf %151, %153 : vector<8x128xf32>
    %155 = arith.addf %135, %154 : vector<8x128xf32>
    %156 = vector.broadcast %143 : vector<1x128xf32> to vector<8x128xf32>
    %157 = arith.mulf %156, %149 : vector<8x128xf32>
    %158 = vector.broadcast %145 : vector<1x128xf32> to vector<8x128xf32>
    %159 = arith.mulf %158, %147 : vector<8x128xf32>
    %160 = arith.addf %157, %159 : vector<8x128xf32>
    %161 = arith.addf %141, %160 : vector<8x128xf32>
    %c0_89 = arith.constant 0 : index
    %c0_90 = arith.constant 0 : index
    %c0_91 = arith.constant 0 : index
    %162 = vector.load %arg6[%c0_89, %c0_90, %c0_91] : memref<1x8x128xf32, #tpu.memory_space<vmem>>, vector<1x8x128xf32>
    %163 = vector.shape_cast %162 : vector<1x8x128xf32> to vector<8x128xf32>
    %164 = vector.shape_cast %155 : vector<8x128xf32> to vector<1x8x128xf32>
    tpu.vector_store %arg6[%c0_89, %c0_90, %c0_91], %164 {strides = array<i32>} : memref<1x8x128xf32, #tpu.memory_space<vmem>>, vector<1x8x128xf32>,
    %c0_92 = arith.constant 0 : index
    %c0_93 = arith.constant 0 : index
    %c0_94 = arith.constant 0 : index
    %165 = vector.load %arg7[%c0_92, %c0_93, %c0_94] : memref<1x8x128xf32, #tpu.memory_space<vmem>>, vector<1x8x128xf32>
    %166 = vector.shape_cast %165 : vector<1x8x128xf32> to vector<8x128xf32>
    %167 = vector.shape_cast %161 : vector<8x128xf32> to vector<1x8x128xf32>
    tpu.vector_store %arg7[%c0_92, %c0_93, %c0_94], %167 {strides = array<i32>} : memref<1x8x128xf32, #tpu.memory_space<vmem>>, vector<1x8x128xf32>,
    return
  }
  func.func @transform_0(%arg0: i32, %arg1: i32) -> (i32, i32, i32) {
    %c0_i32 = arith.constant 0 : i32
    %c0_i32_0 = arith.constant 0 : i32
    %c0_i32_1 = arith.constant 0 : i32
    return %arg0, %c0_i32, %c0_i32_0 : i32, i32, i32
  }
  func.func @transform_1(%arg0: i32, %arg1: i32) -> (i32, i32, i32) {
    %c0_i32 = arith.constant 0 : i32
    %c0_i32_0 = arith.constant 0 : i32
    %c0_i32_1 = arith.constant 0 : i32
    return %arg0, %c0_i32, %c0_i32_0 : i32, i32, i32
  }
  func.func @transform_2(%arg0: i32, %arg1: i32) -> (i32, i32, i32) {
    %c0_i32 = arith.constant 0 : i32
    %c0_i32_0 = arith.constant 0 : i32
    %c0_i32_1 = arith.constant 0 : i32
    return %c0_i32, %arg1, %c0_i32_0 : i32, i32, i32
  }
  func.func @transform_3(%arg0: i32, %arg1: i32) -> (i32, i32, i32) {
    %c0_i32 = arith.constant 0 : i32
    %c0_i32_0 = arith.constant 0 : i32
    %c0_i32_1 = arith.constant 0 : i32
    return %c0_i32, %arg1, %c0_i32_0 : i32, i32, i32
  }
  func.func @transform_4(%arg0: i32, %arg1: i32) -> (i32, i32, i32) {
    %c0_i32 = arith.constant 0 : i32
    %c0_i32_0 = arith.constant 0 : i32
    return %arg0, %arg1, %c0_i32 : i32, i32, i32
  }
  func.func @transform_5(%arg0: i32, %arg1: i32) -> (i32, i32, i32) {
    %c0_i32 = arith.constant 0 : i32
    %c0_i32_0 = arith.constant 0 : i32
    return %arg0, %arg1, %c0_i32 : i32, i32, i32
  }
}

module attributes {stable_mosaic.version = 11 : i64} {
  func.func @_pointwise_kernel(%arg0: i32, %arg1: i32, %arg2: memref<1x8x256xf32, #tpu.memory_space<vmem>>, %arg3: memref<8x8xf32, #tpu.memory_space<vmem>>, %arg4: memref<8x1xf32, #tpu.memory_space<vmem>>, %arg5: memref<1x8x256xf32, #tpu.memory_space<vmem>>, %arg6: memref<1x8x256xf32, #tpu.memory_space<vmem>>) attributes {dimension_semantics = [#tpu.dimension_semantics<parallel>, #tpu.dimension_semantics<parallel>], iteration_bounds = array<i64: 2, 1>, scalar_prefetch = 0 : i64, scratch_operands = 0 : i64, tpu.core_type = #tpu.core_type<tc>, window_params = [{transform_indices = @transform_0, window_bounds = array<i64: 1, 8, 256>}, {pipeline_mode = #tpu.pipeline_mode<synchronous>, transform_indices = @transform_1, window_bounds = array<i64: 8, 8>}, {pipeline_mode = #tpu.pipeline_mode<synchronous>, transform_indices = @transform_2, window_bounds = array<i64: 8, 1>}, {transform_indices = @transform_3, window_bounds = array<i64: 1, 8, 256>}, {transform_indices = @transform_4, window_bounds = array<i64: 1, 8, 256>}]} {
    %c0 = arith.constant 0 : index
    %c0_0 = arith.constant 0 : index
    %c0_1 = arith.constant 0 : index
    %0 = vector.load %arg2[%c0, %c0_0, %c0_1] : memref<1x8x256xf32, #tpu.memory_space<vmem>>, vector<1x8x256xf32>
    %1 = vector.shape_cast %0 : vector<1x8x256xf32> to vector<8x256xf32>
    %c0_2 = arith.constant 0 : index
    %c0_3 = arith.constant 0 : index
    %2 = vector.load %arg3[%c0_2, %c0_3] : memref<8x8xf32, #tpu.memory_space<vmem>>, vector<8x8xf32>
    %cst = arith.constant dense<0.000000e+00> : vector<8x256xf32>
    %3 = tpu.matmul %2, %1, %cst {dimension_numbers = #tpu.dot_dimension_numbers<[1], [0], [0], [1], [0, 0, 1, 1], [], []>} : vector<8x8xf32>, vector<8x256xf32>, vector<8x256xf32> -> vector<8x256xf32>
    %c0_4 = arith.constant 0 : index
    %c0_5 = arith.constant 0 : index
    %4 = vector.load %arg4[%c0_4, %c0_5] : memref<8x1xf32, #tpu.memory_space<vmem>>, vector<8x1xf32>
    %5 = vector.broadcast %4 : vector<8x1xf32> to vector<8x256xf32>
    %6 = arith.addf %3, %5 : vector<8x256xf32>
    %c0_6 = arith.constant 0 : index
    %c0_7 = arith.constant 0 : index
    %c0_8 = arith.constant 0 : index
    %7 = vector.load %arg5[%c0_6, %c0_7, %c0_8] : memref<1x8x256xf32, #tpu.memory_space<vmem>>, vector<1x8x256xf32>
    %8 = vector.shape_cast %7 : vector<1x8x256xf32> to vector<8x256xf32>
    %9 = arith.addf %6, %8 : vector<8x256xf32>
    %cst_9 = arith.constant 5.000000e-01 : f32
    %10 = vector.broadcast %cst_9 : f32 to vector<8x256xf32>
    %11 = arith.mulf %10, %9 : vector<8x256xf32>
    %cst_10 = arith.constant 4.471500e-02 : f32
    %12 = vector.broadcast %cst_10 : f32 to vector<8x256xf32>
    %13 = arith.mulf %12, %9 : vector<8x256xf32>
    %14 = arith.mulf %13, %9 : vector<8x256xf32>
    %15 = arith.mulf %14, %9 : vector<8x256xf32>
    %16 = arith.addf %9, %15 : vector<8x256xf32>
    %cst_11 = arith.constant 0.797884583 : f32
    %17 = vector.broadcast %cst_11 : f32 to vector<8x256xf32>
    %18 = arith.mulf %17, %16 : vector<8x256xf32>
    %19 = math.tanh %18 : vector<8x256xf32>
    %cst_12 = arith.constant 1.000000e+00 : f32
    %20 = vector.broadcast %cst_12 : f32 to vector<8x256xf32>
    %21 = arith.addf %20, %19 : vector<8x256xf32>
    %22 = arith.mulf %11, %21 : vector<8x256xf32>
    %c0_13 = arith.constant 0 : index
    %c0_14 = arith.constant 0 : index
    %c0_15 = arith.constant 0 : index
    %23 = vector.load %arg6[%c0_13, %c0_14, %c0_15] : memref<1x8x256xf32, #tpu.memory_space<vmem>>, vector<1x8x256xf32>
    %24 = vector.shape_cast %23 : vector<1x8x256xf32> to vector<8x256xf32>
    %25 = vector.shape_cast %22 : vector<8x256xf32> to vector<1x8x256xf32>
    tpu.vector_store %arg6[%c0_13, %c0_14, %c0_15], %25 {strides = array<i32>} : memref<1x8x256xf32, #tpu.memory_space<vmem>>, vector<1x8x256xf32>,
    return
  }
  func.func @transform_0(%arg0: i32, %arg1: i32) -> (i32, i32, i32) {
    %c0_i32 = arith.constant 0 : i32
    %c0_i32_0 = arith.constant 0 : i32
    return %arg0, %c0_i32, %arg1 : i32, i32, i32
  }
  func.func @transform_1(%arg0: i32, %arg1: i32) -> (i32, i32) {
    %c0_i32 = arith.constant 0 : i32
    %c0_i32_0 = arith.constant 0 : i32
    %c0_i32_1 = arith.constant 0 : i32
    return %c0_i32, %c0_i32_0 : i32, i32
  }
  func.func @transform_2(%arg0: i32, %arg1: i32) -> (i32, i32) {
    %c0_i32 = arith.constant 0 : i32
    %c0_i32_0 = arith.constant 0 : i32
    %c0_i32_1 = arith.constant 0 : i32
    return %c0_i32, %c0_i32_0 : i32, i32
  }
  func.func @transform_3(%arg0: i32, %arg1: i32) -> (i32, i32, i32) {
    %c0_i32 = arith.constant 0 : i32
    %c0_i32_0 = arith.constant 0 : i32
    return %arg0, %c0_i32, %arg1 : i32, i32, i32
  }
  func.func @transform_4(%arg0: i32, %arg1: i32) -> (i32, i32, i32) {
    %c0_i32 = arith.constant 0 : i32
    %c0_i32_0 = arith.constant 0 : i32
    return %arg0, %c0_i32, %arg1 : i32, i32, i32
  }
}

module attributes {stable_mosaic.version = 11 : i64} {
  func.func @_pointwise_kernel(%arg0: i32, %arg1: i32, %arg2: memref<1x8x256xf32, #tpu.memory_space<vmem>>, %arg3: memref<8x8xf32, #tpu.memory_space<vmem>>, %arg4: memref<8x1xf32, #tpu.memory_space<vmem>>, %arg5: memref<1x8x256xf32, #tpu.memory_space<vmem>>, %arg6: memref<1x8x256xf32, #tpu.memory_space<vmem>>) attributes {dimension_semantics = [#tpu.dimension_semantics<parallel>, #tpu.dimension_semantics<parallel>], iteration_bounds = array<i64: 2, 1>, scalar_prefetch = 0 : i64, scratch_operands = 0 : i64, tpu.core_type = #tpu.core_type<tc>, window_params = [{transform_indices = @transform_0, window_bounds = array<i64: 1, 8, 256>}, {pipeline_mode = #tpu.pipeline_mode<synchronous>, transform_indices = @transform_1, window_bounds = array<i64: 8, 8>}, {pipeline_mode = #tpu.pipeline_mode<synchronous>, transform_indices = @transform_2, window_bounds = array<i64: 8, 1>}, {transform_indices = @transform_3, window_bounds = array<i64: 1, 8, 256>}, {transform_indices = @transform_4, window_bounds = array<i64: 1, 8, 256>}]} {
    %c0 = arith.constant 0 : index
    %c0_0 = arith.constant 0 : index
    %c0_1 = arith.constant 0 : index
    %0 = vector.load %arg2[%c0, %c0_0, %c0_1] : memref<1x8x256xf32, #tpu.memory_space<vmem>>, vector<1x8x256xf32>
    %1 = vector.shape_cast %0 : vector<1x8x256xf32> to vector<8x256xf32>
    %c0_2 = arith.constant 0 : index
    %c0_3 = arith.constant 0 : index
    %2 = vector.load %arg3[%c0_2, %c0_3] : memref<8x8xf32, #tpu.memory_space<vmem>>, vector<8x8xf32>
    %cst = arith.constant dense<0.000000e+00> : vector<8x256xf32>
    %3 = tpu.matmul %2, %1, %cst {dimension_numbers = #tpu.dot_dimension_numbers<[1], [0], [0], [1], [0, 0, 1, 1], [], []>} : vector<8x8xf32>, vector<8x256xf32>, vector<8x256xf32> -> vector<8x256xf32>
    %c0_4 = arith.constant 0 : index
    %c0_5 = arith.constant 0 : index
    %4 = vector.load %arg4[%c0_4, %c0_5] : memref<8x1xf32, #tpu.memory_space<vmem>>, vector<8x1xf32>
    %5 = vector.broadcast %4 : vector<8x1xf32> to vector<8x256xf32>
    %6 = arith.addf %3, %5 : vector<8x256xf32>
    %c0_6 = arith.constant 0 : index
    %c0_7 = arith.constant 0 : index
    %c0_8 = arith.constant 0 : index
    %7 = vector.load %arg5[%c0_6, %c0_7, %c0_8] : memref<1x8x256xf32, #tpu.memory_space<vmem>>, vector<1x8x256xf32>
    %8 = vector.shape_cast %7 : vector<1x8x256xf32> to vector<8x256xf32>
    %9 = arith.addf %6, %8 : vector<8x256xf32>
    %c0_9 = arith.constant 0 : index
    %c0_10 = arith.constant 0 : index
    %c0_11 = arith.constant 0 : index
    %10 = vector.load %arg6[%c0_9, %c0_10, %c0_11] : memref<1x8x256xf32, #tpu.memory_space<vmem>>, vector<1x8x256xf32>
    %11 = vector.shape_cast %10 : vector<1x8x256xf32> to vector<8x256xf32>
    %12 = vector.shape_cast %9 : vector<8x256xf32> to vector<1x8x256xf32>
    tpu.vector_store %arg6[%c0_9, %c0_10, %c0_11], %12 {strides = array<i32>} : memref<1x8x256xf32, #tpu.memory_space<vmem>>, vector<1x8x256xf32>,
    return
  }
  func.func @transform_0(%arg0: i32, %arg1: i32) -> (i32, i32, i32) {
    %c0_i32 = arith.constant 0 : i32
    %c0_i32_0 = arith.constant 0 : i32
    return %arg0, %c0_i32, %arg1 : i32, i32, i32
  }
  func.func @transform_1(%arg0: i32, %arg1: i32) -> (i32, i32) {
    %c0_i32 = arith.constant 0 : i32
    %c0_i32_0 = arith.constant 0 : i32
    %c0_i32_1 = arith.constant 0 : i32
    return %c0_i32, %c0_i32_0 : i32, i32
  }
  func.func @transform_2(%arg0: i32, %arg1: i32) -> (i32, i32) {
    %c0_i32 = arith.constant 0 : i32
    %c0_i32_0 = arith.constant 0 : i32
    %c0_i32_1 = arith.constant 0 : i32
    return %c0_i32, %c0_i32_0 : i32, i32
  }
  func.func @transform_3(%arg0: i32, %arg1: i32) -> (i32, i32, i32) {
    %c0_i32 = arith.constant 0 : i32
    %c0_i32_0 = arith.constant 0 : i32
    return %arg0, %c0_i32, %arg1 : i32, i32, i32
  }
  func.func @transform_4(%arg0: i32, %arg1: i32) -> (i32, i32, i32) {
    %c0_i32 = arith.constant 0 : i32
    %c0_i32_0 = arith.constant 0 : i32
    return %arg0, %c0_i32, %arg1 : i32, i32, i32
  }
}

</mosaic_0001>

<bundles_post_ra>
// kernel: reverse.9
= control target key start
LH: loop header
LB: loop body
LE: loop exit
PB: predicated region body
PF: predicated region fallthrough
CT: control target
= control target key end

     0   :  { %v103_v3 = vlaneseq  ;;  %v96_v18 = vld [vmem:[#allocation0 + $0x7] ss:$-1 sm:$0xff]  ;;  %v110_v19 = vld [vmem:[#allocation0 + $0x17] ss:$-1 sm:$0xff]  ;;  %s604_s0 = inlined_call_operand.vmem [shape: f32[2,8,16,7], index: 0, kind: input, shape index: {}]   ;;  %s605_s1 = inlined_call_operand.vmem [shape: f32[2,8,16,7], index: 1, kind: output, shape index: {}]  }
   0x1   :  { %v60_v0 = vld [vmem:[%s604_s0] sm:$0xff]  ;;  %v62_v1 = vld [vmem:[%s604_s0 + $0x8] sm:$0xff]  ;;  %v64_v2 = vld [vmem:[%s604_s0 + $0x10] sm:$0xff]  ;;  %v97_v20 = vrot.slane %v96_v18, 1  ;;  %v111_v21 = vrot.slane %v110_v19, 1 }
   0x2   :  { %61 = vst [vmem:[#allocation0 + $0x8] sm:$0xff] %v60_v0  ;;  %63 = vst [vmem:[#allocation0 + $0x18] sm:$0xff] %v62_v1  ;;  %v66_v4 = vld [vmem:[%s604_s0 + $0x18] sm:$0xff]  ;;  %v68_v5 = vld [vmem:[%s604_s0 + $0x20] sm:$0xff]  ;;  %v500_v10 = vshrl.u32 %v103_v3, 7 }
   0x3   :  { %65 = vst [vmem:[#allocation0 + $0x28] sm:$0xff] %v64_v2  ;;  %v70_v6 = vld [vmem:[%s604_s0 + $0x28] sm:$0xff]  ;;  %67 = vst [vmem:[#allocation0 + $0x38] sm:$0xff] %v66_v4  ;;  %v72_v7 = vld [vmem:[%s604_s0 + $0x30] sm:$0xff] }
   0x4   :  { %69 = vst [vmem:[#allocation0 + $0x48] sm:$0xff] %v68_v5  ;;  %71 = vst [vmem:[#allocation0 + $0x58] sm:$0xff] %v70_v6  ;;  %v74_v8 = vld [vmem:[%s604_s0 + $0x38] sm:$0xff]  ;;  %v76_v9 = vld [vmem:[%s604_s0 + $0x40] sm:$0xff]  ;;  %vm105_vm0 = vcmp.lt.s32.totalorder %v500_v10, 7 }
   0x5   :  { %73 = vst [vmem:[#allocation0 + $0x68] sm:$0xff] %v72_v7  ;;  %75 = vst [vmem:[#allocation0 + $0x78] sm:$0xff] %v74_v8  ;;  %v78_v11 = vld [vmem:[%s604_s0 + $0x48] sm:$0xff]  ;;  %v80_v12 = vld [vmem:[%s604_s0 + $0x50] sm:$0xff] }
   0x6   :  { %77 = vst [vmem:[#allocation0 + $0x88] sm:$0xff] %v76_v9  ;;  %v82_v13 = vld [vmem:[%s604_s0 + $0x58] sm:$0xff]  ;;  %79 = vst [vmem:[#allocation0 + $0x98] sm:$0xff] %v78_v11  ;;  %v84_v14 = vld [vmem:[%s604_s0 + $0x60] sm:$0xff] }
   0x7   :  { %81 = vst [vmem:[#allocation0 + $0xa8] sm:$0xff] %v80_v12  ;;  %83 = vst [vmem:[#allocation0 + $0xb8] sm:$0xff] %v82_v13  ;;  %v86_v15 = vld [vmem:[%s604_s0 + $0x68] sm:$0xff]  ;;  %v88_v16 = vld [vmem:[%s604_s0 + $0x70] sm:$0xff] }
   0x8   :  { %85 = vst [vmem:[#allocation0 + $0xc8] sm:$0xff] %v84_v14  ;;  %87 = vst [vmem:[#allocation0 + $0xd8] sm:$0xff] %v86_v15  ;;  %v90_v17 = vld [vmem:[%s604_s0 + $0x78] sm:$0xff]  ;;  %v124_v22 = vld [vmem:[#allocation0 + $0x27] ss:$-1 sm:$0xff] }
   0x9   :  { %89 = vst [vmem:[#allocation0 + $0xe8] sm:$0xff] %v88_v16  ;;  %91 = vst [vmem:[#allocation0 + $0xf8] sm:$0xff] %v90_v17  ;;  %v138_v23 = vld [vmem:[#allocation0 + $0x37] ss:$-1 sm:$0xff]  ;;  %v125_v24 = vrot.slane %v124_v22, 1 }
   0xa   :  { %v139_v25 = vrot.slane %v138_v23, 1  ;;  %v152_v26 = vld [vmem:[#allocation0 + $0x47] ss:$-1 sm:$0xff]  ;;  %v166_v27 = vld [vmem:[#allocation0 + $0x57] ss:$-1 sm:$0xff]  ;;  %98 = vst [vmem:[#allocation1] sm:$0xff] %v97_v20 }
   0xb   :  { %v101_v28 = vld [vmem:[#allocation0 + $0xf] ss:$-1 sm:$0xff]  ;;  %112 = vst [vmem:[#allocation1 + $0x8] sm:$0xff] %v111_v21  ;;  %v115_v29 = vld [vmem:[#allocation0 + $0x1f] ss:$-1 sm:$0xff]  ;;  %126 = vst [vmem:[#allocation1 + $0x10] sm:$0xff] %v125_v24 }
   0xc   :  { %v129_v30 = vld [vmem:[#allocation0 + $0x2f] ss:$-1 sm:$0xff]  ;;  %v102_v31 = vrot.slane %v101_v28, 1  ;;  %v116_v32 = vrot.slane %v115_v29, 1  ;;  %140 = vst [vmem:[#allocation1 + $0x18] sm:$0xff] %v139_v25  ;;  %v153_v35 = vrot.slane %v152_v26, 1 }
   0xd   :  { %v130_v33 = vrot.slane %v129_v30, 1  ;;  %v143_v34 = vld [vmem:[#allocation0 + $0x3f] ss:$-1 sm:$0xff]  ;;  %v157_v37 = vld [vmem:[#allocation0 + $0x4f] ss:$-1 sm:$0xff]  ;;  %v167_v38 = vrot.slane %v166_v27, 1 }
   0xe   :  { %v144_v36 = vrot.slane %v143_v34, 1  ;;  %v171_v39 = vld [vmem:[#allocation0 + $0x5f] ss:$-1 sm:$0xff]  ;;  %106 = vst.msk [vmem:[#allocation1] sm:$0xff] %vm105_vm0, %v102_v31  ;;  %120 = vst.msk [vmem:[#allocation1 + $0x8] sm:$0xff] %vm105_vm0, %v116_v32  ;;  %v158_v40 = vrot.slane %v157_v37, 1 }
   0xf   :  { %134 = vst.msk [vmem:[#allocation1 + $0x10] sm:$0xff] %vm105_vm0, %v130_v33  ;;  %154 = vst [vmem:[#allocation1 + $0x20] sm:$0xff] %v153_v35  ;;  %v172_v41 = vrot.slane %v171_v39, 1  ;;  %v180_v42 = vld [vmem:[#allocation0 + $0x67] ss:$-1 sm:$0xff] }
  0x10   :  { %v185_v43 = vld [vmem:[#allocation0 + $0x6f] ss:$-1 sm:$0xff]  ;;  %148 = vst.msk [vmem:[#allocation1 + $0x18] sm:$0xff] %vm105_vm0, %v144_v36  ;;  %168 = vst [vmem:[#allocation1 + $0x28] sm:$0xff] %v167_v38  ;;  %v181_v44 = vrot.slane %v180_v42, 1 }
  0x11   :  { %v186_v45 = vrot.slane %v185_v43, 1  ;;  %v194_v46 = vld [vmem:[#allocation0 + $0x77] ss:$-1 sm:$0xff]  ;;  %v199_v47 = vld [vmem:[#allocation0 + $0x7f] ss:$-1 sm:$0xff]  ;;  %162 = vst.msk [vmem:[#allocation1 + $0x20] sm:$0xff] %vm105_vm0, %v158_v40 }
  0x12   :  { %176 = vst.msk [vmem:[#allocation1 + $0x28] sm:$0xff] %vm105_vm0, %v172_v41  ;;  %v195_v48 = vrot.slane %v194_v46, 1  ;;  %v200_v49 = vrot.slane %v199_v47, 1  ;;  %v208_v50 = vld [vmem:[#allocation0 + $0x87] ss:$-1 sm:$0xff]  ;;  %182 = vst [vmem:[#allocation1 + $0x30] sm:$0xff] %v181_v44 }
  0x13   :  { %v213_v51 = vld [vmem:[#allocation0 + $0x8f] ss:$-1 sm:$0xff]  ;;  %v209_v52 = vrot.slane %v208_v50, 1  ;;  %v222_v54 = vld [vmem:[#allocation0 + $0x97] ss:$-1 sm:$0xff]  ;;  %190 = vst.msk [vmem:[#allocation1 + $0x30] sm:$0xff] %vm105_vm0, %v186_v45 }
  0x14   :  { %v214_v53 = vrot.slane %v213_v51, 1  ;;  %v227_v55 = vld [vmem:[#allocation0 + $0x9f] ss:$-1 sm:$0xff]  ;;  %196 = vst [vmem:[#allocation1 + $0x38] sm:$0xff] %v195_v48  ;;  %v223_v56 = vrot.slane %v222_v54, 1 }
  0x15   :  { %v228_v57 = vrot.slane %v227_v55, 1  ;;  %v236_v58 = vld [vmem:[#allocation0 + $0xa7] ss:$-1 sm:$0xff]  ;;  %v241_v59 = vld [vmem:[#allocation0 + $0xaf] ss:$-1 sm:$0xff]  ;;  %204 = vst.msk [vmem:[#allocation1 + $0x38] sm:$0xff] %vm105_vm0, %v200_v49 }
  0x16   :  { %210 = vst [vmem:[#allocation1 + $0x40] sm:$0xff] %v209_v52  ;;  %v237_v60 = vrot.slane %v236_v58, 1  ;;  %v242_v61 = vrot.slane %v241_v59, 1  ;;  %v250_v62 = vld [vmem:[#allocation0 + $0xb7] ss:$-1 sm:$0xff]  ;;  %224 = vst [vmem:[#allocation1 + $0x48] sm:$0xff] %v223_v56 }
  0x17   :  { %v255_v63 = vld [vmem:[#allocation0 + $0xbf] ss:$-1 sm:$0xff]  ;;  %218 = vst.msk [vmem:[#allocation1 + $0x40] sm:$0xff] %vm105_vm0, %v214_v53  ;;  %v251_v0 = vrot.slane %v250_v62, 1  ;;  %v264_v2 = vld [vmem:[#allocation0 + $0xc7] ss:$-1 sm:$0xff] }
  0x18   :  { %v256_v1 = vrot.slane %v255_v63, 1  ;;  %v269_v3 = vld [vmem:[#allocation0 + $0xcf] ss:$-1 sm:$0xff]  ;;  %232 = vst.msk [vmem:[#allocation1 + $0x48] sm:$0xff] %vm105_vm0, %v228_v57  ;;  %238 = vst [vmem:[#allocation1 + $0x50] sm:$0xff] %v237_v60  ;;  %v265_v4 = vrot.slane %v264_v2, 1 }
  0x19   :  { %v270_v5 = vrot.slane %v269_v3, 1  ;;  %v278_v6 = vld [vmem:[#allocation0 + $0xd7] ss:$-1 sm:$0xff]  ;;  %v283_v7 = vld [vmem:[#allocation0 + $0xdf] ss:$-1 sm:$0xff]  ;;  %246 = vst.msk [vmem:[#allocation1 + $0x50] sm:$0xff] %vm105_vm0, %v242_v61 }
  0x1a   :  { %252 = vst [vmem:[#allocation1 + $0x58] sm:$0xff] %v251_v0  ;;  %v279_v8 = vrot.slane %v278_v6, 1  ;;  %v284_v9 = vrot.slane %v283_v7, 1  ;;  %v292_v11 = vld [vmem:[#allocation0 + $0xe7] ss:$-1 sm:$0xff]  ;;  %266 = vst [vmem:[#allocation1 + $0x60] sm:$0xff] %v265_v4 }
  0x1b   :  { %v297_v12 = vld [vmem:[#allocation0 + $0xef] ss:$-1 sm:$0xff]  ;;  %260 = vst.msk [vmem:[#allocation1 + $0x58] sm:$0xff] %vm105_vm0, %v256_v1  ;;  %v293_v13 = vrot.slane %v292_v11, 1  ;;  %v306_v15 = vld [vmem:[#allocation0 + $0xf7] ss:$-1 sm:$0xff] }
  0x1c   :  { %v298_v14 = vrot.slane %v297_v12, 1  ;;  %v311_v16 = vld [vmem:[#allocation0 + $0xff] ss:$-1 sm:$0xff]  ;;  %274 = vst.msk [vmem:[#allocation1 + $0x60] sm:$0xff] %vm105_vm0, %v270_v5  ;;  %280 = vst [vmem:[#allocation1 + $0x68] sm:$0xff] %v279_v8  ;;  %v307_v17 = vrot.slane %v306_v15, 1 }
  0x1d   :  { %v312_v18 = vrot.slane %v311_v16, 1  ;;  %v374_v19 = vld [vmem:[#allocation1] sm:$0xff]  ;;  %v376_v20 = vld [vmem:[#allocation1 + $0x8] sm:$0xff]  ;;  %v378_v21 = vld [vmem:[#allocation1 + $0x10] sm:$0xff]  ;;  %288 = vst.msk [vmem:[#allocation1 + $0x68] sm:$0xff] %vm105_vm0, %v284_v9 }
  0x1e   :  { %294 = vst [vmem:[#allocation1 + $0x70] sm:$0xff] %v293_v13  ;;  %375 = vst [vmem:[%s605_s1] sm:$0xff] %v374_v19  ;;  %v380_v22 = vld [vmem:[#allocation1 + $0x18] sm:$0xff]  ;;  %v382_v23 = vld [vmem:[#allocation1 + $0x20] sm:$0xff] }
  0x1f   :  { %377 = vst [vmem:[%s605_s1 + $0x8] sm:$0xff] %v376_v20  ;;  %379 = vst [vmem:[%s605_s1 + $0x10] sm:$0xff] %v378_v21  ;;  %v384_v24 = vld [vmem:[#allocation1 + $0x28] sm:$0xff]  ;;  %v386_v25 = vld [vmem:[#allocation1 + $0x30] sm:$0xff] }
  0x20   :  { %302 = vst.msk [vmem:[#allocation1 + $0x70] sm:$0xff] %vm105_vm0, %v298_v14  ;;  %308 = vst [vmem:[#allocation1 + $0x78] sm:$0xff] %v307_v17  ;;  %v388_v26 = vld [vmem:[#allocation1 + $0x38] sm:$0xff]  ;;  %v390_v10 = vld [vmem:[#allocation1 + $0x40] sm:$0xff] }
  0x21   :  { %381 = vst [vmem:[%s605_s1 + $0x18] sm:$0xff] %v380_v22  ;;  %383 = vst [vmem:[%s605_s1 + $0x20] sm:$0xff] %v382_v23  ;;  %v392_v27 = vld [vmem:[#allocation1 + $0x48] sm:$0xff]  ;;  %v394_v28 = vld [vmem:[#allocation1 + $0x50] sm:$0xff] }
  0x22   :  { %385 = vst [vmem:[%s605_s1 + $0x28] sm:$0xff] %v384_v24  ;;  %316 = vst.msk [vmem:[#allocation1 + $0x78] sm:$0xff] %vm105_vm0, %v312_v18  ;;  %v396_v29 = vld [vmem:[#allocation1 + $0x58] sm:$0xff] }
  0x23   :  { %387 = vst [vmem:[%s605_s1 + $0x30] sm:$0xff] %v386_v25  ;;  %389 = vst [vmem:[%s605_s1 + $0x38] sm:$0xff] %v388_v26  ;;  %v398_v30 = vld [vmem:[#allocation1 + $0x60] sm:$0xff] }
  0x24   :  { %391 = vst [vmem:[%s605_s1 + $0x40] sm:$0xff] %v390_v10  ;;  %393 = vst [vmem:[%s605_s1 + $0x48] sm:$0xff] %v392_v27  ;;  %v400_v31 = vld [vmem:[#allocation1 + $0x68] sm:$0xff] }
  0x25   :  { %395 = vst [vmem:[%s605_s1 + $0x50] sm:$0xff] %v394_v28  ;;  %397 = vst [vmem:[%s605_s1 + $0x58] sm:$0xff] %v396_v29 }
  0x26   :  { %399 = vst [vmem:[%s605_s1 + $0x60] sm:$0xff] %v398_v30  ;;  %401 = vst [vmem:[%s605_s1 + $0x68] sm:$0xff] %v400_v31 }
  0x27   :  { %v402_v32 = vld [vmem:[#allocation1 + $0x70] sm:$0xff] }
  0x28   :  { %403 = vst [vmem:[%s605_s1 + $0x70] sm:$0xff] %v402_v32 }
  0x29   :  { %v404_v33 = vld [vmem:[#allocation1 + $0x78] sm:$0xff] }
  0x2a   :  { %405 = vst [vmem:[%s605_s1 + $0x78] sm:$0xff] %v404_v33 }

// kernel: fno2d_forward.8
= control target key start
LH: loop header
LB: loop body
LE: loop exit
PB: predicated region body
PF: predicated region fallthrough
CT: control target
= control target key end

     0   :  { %s762_s18 = smov 0   ;;  %s764_s19 = smov 0   ;;  %s875_s0 = inlined_call_operand.vmem [shape: f32[2,8,128], index: 0, kind: input, shape index: {}]   ;;  %s876_s1 = inlined_call_operand.vmem [shape: f32[2,8,128], index: 1, kind: input, shape index: {}]   ;;  %s877_s2 = inlined_call_operand.vmem [shape: f32[8,8,128], index: 2, kind: input, shape index: {}]   ;;  %s878_s3 = inlined_call_operand.vmem [shape: f32[8,8,128], index: 3, kind: input, shape index: {}]   ;;  %s879_s4 = inlined_call_operand.vmem [shape: f32[2,8,128], index: 4, kind: output, shape index: {0}]   ;;  %s880_s5 = inlined_call_operand.vmem [shape: f32[2,8,128], index: 5, kind: output, shape index: {1}]  }
   0x1   :  { %s766_s20 = smov 0  }
   0x2 LB: > { %s28_s21 = sadd.s32 1, %s726_s19  ;;  %p647_p0 = scmp.ge.s32.totalorder %s730_s20, 1  ;;  %s730_s20 = sphi %s766_s20, %s16_s20   ;;  %s726_s19 = sphi %s764_s19, %s882_s19   ;;  %s722_s18 = sphi %s762_s18, %s881_s18  }
   0x3   : > { %p30_p1 = scmp.ge.s32.totalorder %s28_s21, 2  ;;  %p232_p2 = scmp.lt.s32.totalorder %s730_s20, 3 }
   0x5   : > { %s884_s21 = smov (%p30_p1, %s28_s21), 0  ;;  %p233_p3 = pnand %p647_p0, %p232_p2 }
   0x6   : > { %p280_p4 = scmp.lt.s32.totalorder (!%p233_p3), %s722_s18, 1  ;;  %v312_v0 = vld [vmem:[%s877_s2] sm:$0xff] (!%p233_p3)  ;;  %v654_v2 = vld [vmem:[%s877_s2 + $0x8] sm:$0xff] (!%p233_p3)  ;;  %v658_v4 = vld [vmem:[%s877_s2 + $0x10] sm:$0xff] (!%p233_p3) }
   0x7   : > { %236 = sbr.rel (%p233_p3) target bundleno = 43 (0x2b), region = 36  ;;  %v313_v1 = vld [vmem:[%s878_s3] sm:$0xff] (!%p233_p3)  ;;  %v655_v3 = vld [vmem:[%s878_s3 + $0x8] sm:$0xff] (!%p233_p3)  ;;  %v659_v5 = vld [vmem:[%s878_s3 + $0x10] sm:$0xff] (!%p233_p3) }
   0x8   : > { %v662_v6 = vld [vmem:[%s877_s2 + $0x18] sm:$0xff] (!%p233_p3)  ;;  %v666_v8 = vld [vmem:[%s877_s2 + $0x20] sm:$0xff] (!%p233_p3)  ;;  %v670_v13 = vld [vmem:[%s877_s2 + $0x28] sm:$0xff] (!%p233_p3) }
   0x9   : > { %v663_v7 = vld [vmem:[%s878_s3 + $0x18] sm:$0xff] (!%p233_p3)  ;;  %v667_v9 = vld [vmem:[%s878_s3 + $0x20] sm:$0xff] (!%p233_p3)  ;;  %v671_v14 = vld [vmem:[%s878_s3 + $0x28] sm:$0xff] (!%p233_p3) }
   0xa   : > { %v674_v21 = vld [vmem:[%s877_s2 + $0x30] sm:$0xff] (!%p233_p3)  ;;  %v678_v29 = vld [vmem:[%s877_s2 + $0x38] sm:$0xff] (!%p233_p3) }
   0xb   : > { %v675_v22 = vld [vmem:[%s878_s3 + $0x30] sm:$0xff] (!%p233_p3)  ;;  %v679_v30 = vld [vmem:[%s878_s3 + $0x38] sm:$0xff] (!%p233_p3) }
   0xe   : > { %s886_s18 = smov (!%p280_p4, %s722_s18), 1 }
   0xf   : > { %s792_s30 = sshll.u32 %s886_s18, 3 }
  0x10   : > { %s807_s14 = scalar_lea.vmem %s875_s0, %s792_s30  ;;  %s813_s17 = scalar_lea.vmem %s876_s1, %s792_s30 }
  0x11   : > { %v652_v10 = vld [vmem:[%s807_s14] ss:$0 sm:$0xff]  ;;  %v656_v12 = vld [vmem:[%s807_s14 + $0x1] ss:$0 sm:$0xff]  ;;  %v660_v19 = vld [vmem:[%s807_s14 + $0x2] ss:$0 sm:$0xff]  ;;  %s309_s23 = scalar_lea.vmem %s880_s5, %s792_s30 }
  0x12   : > { %v653_v11 = vld [vmem:[%s813_s17] ss:$0 sm:$0xff]  ;;  %v318_v15 = vmul.f32 %v652_v10, %v312_v0  ;;  %v657_v17 = vld [vmem:[%s813_s17 + $0x1] ss:$0 sm:$0xff]  ;;  %v340_v18 = vmul.f32 %v656_v12, %v654_v2  ;;  %v661_v20 = vld [vmem:[%s813_s17 + $0x2] ss:$0 sm:$0xff]  ;;  %v362_v24 = vmul.f32 %v660_v19, %v658_v4  ;;  %v326_v31 = vmul.f32 %v652_v10, %v313_v1 }
  0x13   : > { %v323_v16 = vmul.f32 %v653_v11, %v313_v1  ;;  %v345_v23 = vmul.f32 %v657_v17, %v655_v3  ;;  %v367_v25 = vmul.f32 %v661_v20, %v659_v5  ;;  %v664_v26 = vld [vmem:[%s807_s14 + $0x3] ss:$0 sm:$0xff]  ;;  %v668_v28 = vld [vmem:[%s807_s14 + $0x4] ss:$0 sm:$0xff]  ;;  %v672_v37 = vld [vmem:[%s807_s14 + $0x5] ss:$0 sm:$0xff]  ;;  %v327_v45 = vmul.f32 %v653_v11, %v312_v0 }
  0x14   : > { %v665_v27 = vld [vmem:[%s813_s17 + $0x3] ss:$0 sm:$0xff]  ;;  %v384_v33 = vmul.f32 %v664_v26, %v662_v6  ;;  %v669_v35 = vld [vmem:[%s813_s17 + $0x4] ss:$0 sm:$0xff]  ;;  %v406_v36 = vmul.f32 %v668_v28, %v666_v8  ;;  %v673_v38 = vld [vmem:[%s813_s17 + $0x5] ss:$0 sm:$0xff]  ;;  %v428_v46 = vmul.f32 %v672_v37, %v670_v13  ;;  %v348_v56 = vmul.f32 %v656_v12, %v655_v3 }
  0x15   : > { %v324_v32 = vsub.f32 %v318_v15, %v323_v16  ;;  %v389_v34 = vmul.f32 %v665_v27, %v663_v7  ;;  %v346_v39 = vsub.f32 %v340_v18, %v345_v23  ;;  %v368_v40 = vsub.f32 %v362_v24, %v367_v25  ;;  %v676_v42 = vld [vmem:[%s807_s14 + $0x6] ss:$0 sm:$0xff]  ;;  %v680_v44 = vld [vmem:[%s807_s14 + $0x7] ss:$0 sm:$0xff] }
  0x16   : > { %v411_v41 = vmul.f32 %v669_v35, %v667_v9  ;;  %v677_v43 = vld [vmem:[%s813_s17 + $0x6] ss:$0 sm:$0xff]  ;;  %v433_v47 = vmul.f32 %v673_v38, %v671_v14  ;;  %v681_v48 = vld [vmem:[%s813_s17 + $0x7] ss:$0 sm:$0xff]  ;;  %v450_v51 = vmul.f32 %v676_v42, %v674_v21  ;;  %v472_v54 = vmul.f32 %v680_v44, %v678_v29  ;;  %s302_s17 = scalar_lea.vmem %s879_s4, %s792_s30 }
  0x17   : > { %v347_v49 = vadd.f32 %v346_v39, %v324_v32  ;;  %v390_v50 = vsub.f32 %v384_v33, %v389_v34  ;;  %v455_v52 = vmul.f32 %v677_v43, %v675_v22  ;;  %v477_v55 = vmul.f32 %v681_v48, %v679_v30 }
  0x18   : > { %v412_v53 = vsub.f32 %v406_v36, %v411_v41  ;;  %v328_v58 = vadd.f32 %v327_v45, %v326_v31  ;;  %v349_v59 = vmul.f32 %v657_v17, %v654_v2  ;;  %v370_v60 = vmul.f32 %v660_v19, %v659_v5 }
  0x19   : > { %v369_v57 = vadd.f32 %v368_v40, %v347_v49  ;;  %v434_v61 = vsub.f32 %v428_v46, %v433_v47  ;;  %v371_v62 = vmul.f32 %v661_v20, %v658_v4  ;;  %v392_v63 = vmul.f32 %v664_v26, %v663_v7 }
  0x1a   : > { %v393_v1 = vmul.f32 %v665_v27, %v662_v6  ;;  %v350_v10 = vadd.f32 %v349_v59, %v348_v56  ;;  %v414_v11 = vmul.f32 %v668_v28, %v667_v9  ;;  %v415_v15 = vmul.f32 %v669_v35, %v666_v8 }
  0x1b   : > { %v391_v0 = vadd.f32 %v390_v50, %v369_v57  ;;  %v372_v16 = vadd.f32 %v371_v62, %v370_v60  ;;  %v436_v18 = vmul.f32 %v672_v37, %v671_v14  ;;  %v437_v23 = vmul.f32 %v673_v38, %v670_v13 }
  0x1c   : > { %v456_v25 = vsub.f32 %v450_v51, %v455_v52  ;;  %v351_v32 = vadd.f32 %v350_v10, %v328_v58  ;;  %v394_v3 = vadd.f32 %v393_v1, %v392_v63  ;;  %v478_v12 = vsub.f32 %v472_v54, %v477_v55 }
  0x1d   : > { %v413_v24 = vadd.f32 %v412_v53, %v391_v0  ;;  %v458_v31 = vmul.f32 %v676_v42, %v675_v22  ;;  %v416_v4 = vadd.f32 %v415_v15, %v414_v11  ;;  %v459_v7 = vmul.f32 %v677_v43, %v674_v21 }
  0x1e   : > { %v373_v5 = vadd.f32 %v372_v16, %v351_v32  ;;  %v438_v6 = vadd.f32 %v437_v23, %v436_v18  ;;  %v480_v9 = vmul.f32 %v680_v44, %v679_v30  ;;  %v481_v8 = vmul.f32 %v681_v48, %v678_v29 }
  0x1f   : > { %v435_v2 = vadd.f32 %v434_v61, %v413_v24  ;;  %v460_v20 = vadd.f32 %v459_v7, %v458_v31 }
  0x20   : > { %v395_v19 = vadd.f32 %v394_v3, %v373_v5  ;;  %v482_v22 = vadd.f32 %v481_v8, %v480_v9 }
  0x21   : > { %v457_v17 = vadd.f32 %v456_v25, %v435_v2 }
  0x22   : > { %v417_v14 = vadd.f32 %v416_v4, %v395_v19 }
  0x23   : > { %v479_v13 = vadd.f32 %v478_v12, %v457_v17 }
  0x24   : > { %v439_v26 = vadd.f32 %v438_v6, %v417_v14 }
  0x25   : > { %484 = vst [vmem:[%s302_s17] sm:$0xff] %v479_v13 }
  0x26   : > { %v461_v27 = vadd.f32 %v460_v20, %v439_v26 }
  0x28   : > { %v483_v21 = vadd.f32 %v482_v22, %v461_v27 }
  0x2a   : > { %485 = vst [vmem:[%s309_s23] sm:$0xff] %v483_v21 }
  0x2b PF: > { %s16_s20 = sadd.s32 1, %s730_s20   ;;  %s881_s18 = smov %s726_s19 }
  0x2c   : > { %p13_p5 = scmp.ge.s32.totalorder %s16_s20, 4   ;;  %s882_s19 = smov %s884_s21 }
  0x2e   :  { %15 = sbr.rel (!%p13_p5) target bundleno = 2 (0x2), region = 101 }

// kernel: fno2d_forward.9
= control target key start
LH: loop header
LB: loop body
LE: loop exit
PB: predicated region body
PF: predicated region fallthrough
CT: control target
= control target key end

     0   :  { %s585_s15 = smov 0   ;;  %s587_s16 = smov 0   ;;  %s632_s0 = inlined_call_operand.vmem [shape: f32[2,8,256], index: 0, kind: input, shape index: {}]   ;;  %s633_s1 = inlined_call_operand.vmem [shape: f32[8,8], index: 1, kind: input, shape index: {}]   ;;  %s634_s2 = inlined_call_operand.vmem [shape: f32[8,1], index: 2, kind: input, shape index: {}]   ;;  %s635_s3 = inlined_call_operand.vmem [shape: f32[2,8,256], index: 3, kind: input, shape index: {}, may-alias: {3,4}]   ;;  %s636_s4 = inlined_call_operand.vmem [shape: f32[2,8,256], index: 4, kind: output, shape index: {}, may-alias: {3,4}]  }
   0x1   :  { %s589_s17 = smov 0  }
   0x2 LB: > { %s26_s18 = sadd.s32 1, %s552_s16  ;;  %p490_p0 = scmp.ge.s32.totalorder %s556_s17, 1  ;;  %s556_s17 = sphi %s589_s17, %s14_s17   ;;  %s552_s16 = sphi %s587_s16, %s638_s16   ;;  %s548_s15 = sphi %s585_s15, %s637_s15  }
   0x3   : > { %p28_p1 = scmp.ge.s32.totalorder %s26_s18, 2  ;;  %p200_p2 = scmp.lt.s32.totalorder %s556_s17, 3 }
   0x5   : > { %s640_s18 = smov (%p28_p1, %s26_s18), 0  ;;  %p201_p3 = pnand %p490_p0, %p200_p2 }
   0x6   : > { %p244_p4 = scmp.lt.s32.totalorder (!%p201_p3), %s548_s15, 1  ;;  %v276_v0 = vld [vmem:[%s634_s2] sm:$0xff] (!%p201_p3)  ;;  %v558_v1 = vmov (!%p201_p3), 0.0   ;;  %v559_v2 = vmov (!%p201_p3), 0   ;;  %vm282_vm0 = vcmask (!%p201_p3), 64512  }
   0x7   : > { %204 = sbr.rel (%p201_p3) target bundleno = 263 (0x107), region = 36  ;;  %350 = vmatprep.mubr.f32.mxu0 (!%p201_p3), %v558_v1  ;;  %529 = vset.pattern.permute.xlu0 (!%p201_p3), %v559_v2  ;;  %v275_v5 = vld [vmem:[%s633_s1] sm:$0xff] (!%p201_p3) }
   0x8   : > { %279 = vperm.xlu0 (!%p201_p3), %529, %v276_v0  }
   0xe   : > { %s642_s15 = smov (!%p244_p4, %s548_s15), 1 }
   0xf   : > { %s606_s21 = sshll.u32 %s642_s15, 4 }
  0x10   : > { %s251_s24 = scalar_lea.vmem %s632_s0, %s606_s21  ;;  %s261_s29 = scalar_lea.vmem %s635_s3, %s606_s21 }
  0x11   : > { %v274_v3 = vld [vmem:[%s251_s24 + $0x8] sm:$0xff]  ;;  %v273_v4 = vld [vmem:[%s251_s24] sm:$0xff]  ;;  %s271_s6 = scalar_lea.vmem %s636_s4, %s606_s21 }
  0x12   : > { %286 = vmatprep.subr.mxu0 %v274_v3  ;;  %v357_v8 = vld [vmem:[%s261_s29] sm:$0xff]  ;;  %v358_v11 = vld [vmem:[%s261_s29 + $0x8] sm:$0xff] }
  0x13   : > { %287 = vmatpush1.msra.mxu0 %v273_v4 }
  0x14   : > { %497 = vmatmul.mubr.msk.f32.vlgmr.msra.gmra.mrb[0].mxu0 %vm282_vm0, %v275_v5 }
  0x87   : > { %v280_v6 = vpop.permute.xlu0 %279 }
  0xe7   : > { %v352_v7 = vpop.f32.mrb[0].mxu0 }
  0xe8   : > { %v353_v9 = vadd.f32 %v352_v7, %v280_v6  ;;  %v354_v10 = vpop.f32.mrb[1].mxu0 }
  0xe9   : > { %v355_v12 = vadd.f32 %v354_v10, %v280_v6 }
  0xea   : > { %v359_v13 = vadd.f32 %v357_v8, %v353_v9 }
  0xeb   : > { %v360_v14 = vadd.f32 %v358_v11, %v355_v12 }
  0xec   : > { %v363_v15 = vmul.f32 0.044715, %v359_v13  ;;  %v361_v27 = vmul.f32 0.5, %v359_v13 }
  0xed   : > { %v364_v16 = vmul.f32 0.044715, %v360_v14  ;;  %v362_v29 = vmul.f32 0.5, %v360_v14 }
  0xee   : > { %v365_v17 = vmul.f32 %v363_v15, %v359_v13 }
  0xef   : > { %v366_v18 = vmul.f32 %v364_v16, %v360_v14 }
  0xf0   : > { %v367_v19 = vmul.f32 %v365_v17, %v359_v13 }
  0xf1   : > { %v368_v20 = vmul.f32 %v366_v18, %v360_v14 }
  0xf2   : > { %v369_v21 = vadd.f32 %v367_v19, %v359_v13 }
  0xf3   : > { %v370_v22 = vadd.f32 %v368_v20, %v360_v14 }
  0xf4   : > { %v371_v23 = vmul.f32 0.7978846, %v369_v21 }
  0xf5   : > { %v372_v24 = vmul.f32 0.7978846, %v370_v22 }
  0xf6   : > { %530 = vtanh.f32 %v371_v23 }
  0xf7   : > { %532 = vtanh.f32 %v372_v24 }
 0x100   : > { %v531_v25 = vpop.eup %530 }
 0x101   : > { %v533_v26 = vpop.eup %532  ;;  %v375_v28 = vadd.f32 1.0, %v531_v25 }
 0x102   : > { %v376_v30 = vadd.f32 1.0, %v533_v26 }
 0x103   : > { %v377_v31 = vmul.f32 %v375_v28, %v361_v27 }
 0x104   : > { %v378_v32 = vmul.f32 %v376_v30, %v362_v29 }
 0x105   : > { %379 = vst [vmem:[%s271_s6] sm:$0xff] %v377_v31 }
 0x106   : > { %380 = vst [vmem:[%s271_s6 + $0x8] sm:$0xff] %v378_v32 }
 0x107 PF: > { %s14_s17 = sadd.s32 1, %s556_s17   ;;  %s637_s15 = smov %s552_s16 }
 0x108   : > { %p11_p5 = scmp.ge.s32.totalorder %s14_s17, 4   ;;  %s638_s16 = smov %s640_s18 }
 0x10a   :  { %13 = sbr.rel (!%p11_p5) target bundleno = 2 (0x2), region = 69 }

// kernel: fno2d_forward.15
= control target key start
LH: loop header
LB: loop body
LE: loop exit
PB: predicated region body
PF: predicated region fallthrough
CT: control target
= control target key end

     0   :  { %s563_s15 = smov 0   ;;  %s565_s16 = smov 0   ;;  %s605_s0 = inlined_call_operand.vmem [shape: f32[2,8,256], index: 0, kind: input, shape index: {}]   ;;  %s606_s1 = inlined_call_operand.vmem [shape: f32[8,8], index: 1, kind: input, shape index: {}]   ;;  %s607_s2 = inlined_call_operand.vmem [shape: f32[8,1], index: 2, kind: input, shape index: {}]   ;;  %s608_s3 = inlined_call_operand.vmem [shape: f32[2,8,256], index: 3, kind: input, shape index: {}, may-alias: {3,4}]   ;;  %s609_s4 = inlined_call_operand.vmem [shape: f32[2,8,256], index: 4, kind: output, shape index: {}, may-alias: {3,4}]  }
   0x1   :  { %s567_s17 = smov 0  }
   0x2 LB: > { %s26_s18 = sadd.s32 1, %s530_s16  ;;  %p472_p0 = scmp.ge.s32.totalorder %s534_s17, 1  ;;  %s534_s17 = sphi %s567_s17, %s14_s17   ;;  %s530_s16 = sphi %s565_s16, %s611_s16   ;;  %s526_s15 = sphi %s563_s15, %s610_s15  }
   0x3   : > { %p28_p1 = scmp.ge.s32.totalorder %s26_s18, 2  ;;  %p200_p2 = scmp.lt.s32.totalorder %s534_s17, 3 }
   0x5   : > { %s613_s18 = smov (%p28_p1, %s26_s18), 0  ;;  %p201_p3 = pnand %p472_p0, %p200_p2 }
   0x6   : > { %p244_p4 = scmp.lt.s32.totalorder (!%p201_p3), %s526_s15, 1  ;;  %v276_v0 = vld [vmem:[%s607_s2] sm:$0xff] (!%p201_p3)  ;;  %v536_v1 = vmov (!%p201_p3), 0.0   ;;  %v537_v2 = vmov (!%p201_p3), 0   ;;  %vm282_vm0 = vcmask (!%p201_p3), 64512  }
   0x7   : > { %204 = sbr.rel (%p201_p3) target bundleno = 238 (0xee), region = 36  ;;  %350 = vmatprep.mubr.f32.mxu0 (!%p201_p3), %v536_v1  ;;  %511 = vset.pattern.permute.xlu0 (!%p201_p3), %v537_v2  ;;  %v275_v5 = vld [vmem:[%s606_s1] sm:$0xff] (!%p201_p3) }
   0x8   : > { %279 = vperm.xlu0 (!%p201_p3), %511, %v276_v0  }
   0xe   : > { %s615_s15 = smov (!%p244_p4, %s526_s15), 1 }
   0xf   : > { %s482_s21 = sshll.u32 %s615_s15, 4 }
  0x10   : > { %s251_s24 = scalar_lea.vmem %s605_s0, %s482_s21  ;;  %s261_s29 = scalar_lea.vmem %s608_s3, %s482_s21 }
  0x11   : > { %v274_v3 = vld [vmem:[%s251_s24 + $0x8] sm:$0xff]  ;;  %v273_v4 = vld [vmem:[%s251_s24] sm:$0xff]  ;;  %s271_s6 = scalar_lea.vmem %s609_s4, %s482_s21 }
  0x12   : > { %286 = vmatprep.subr.mxu0 %v274_v3  ;;  %v357_v8 = vld [vmem:[%s261_s29] sm:$0xff]  ;;  %v358_v11 = vld [vmem:[%s261_s29 + $0x8] sm:$0xff] }
  0x13   : > { %287 = vmatpush1.msra.mxu0 %v273_v4 }
  0x14   : > { %479 = vmatmul.mubr.msk.f32.vlgmr.msra.gmra.mrb[0].mxu0 %vm282_vm0, %v275_v5 }
  0x87   : > { %v280_v6 = vpop.permute.xlu0 %279 }
  0xe7   : > { %v352_v7 = vpop.f32.mrb[0].mxu0 }
  0xe8   : > { %v353_v9 = vadd.f32 %v352_v7, %v280_v6  ;;  %v354_v10 = vpop.f32.mrb[1].mxu0 }
  0xe9   : > { %v355_v12 = vadd.f32 %v354_v10, %v280_v6 }
  0xea   : > { %v359_v13 = vadd.f32 %v357_v8, %v353_v9 }
  0xeb   : > { %v360_v14 = vadd.f32 %v358_v11, %v355_v12 }
  0xec   : > { %361 = vst [vmem:[%s271_s6] sm:$0xff] %v359_v13 }
  0xed   : > { %362 = vst [vmem:[%s271_s6 + $0x8] sm:$0xff] %v360_v14 }
  0xee PF: > { %s14_s17 = sadd.s32 1, %s534_s17   ;;  %s610_s15 = smov %s530_s16 }
  0xef   : > { %p11_p5 = scmp.ge.s32.totalorder %s14_s17, 4   ;;  %s611_s16 = smov %s613_s18 }
  0xf1   :  { %13 = sbr.rel (!%p11_p5) target bundleno = 2 (0x2), region = 69 }

</bundles_post_ra>
